<compile_context>
chip_gen: v7x
topology: tpu7x:2x2x1
jax: 0.10.0
libtpu: 0.0.40
codegen_flags: <defaults>
</compile_context>

<pallas_src>
import math
import functools

import jax
import jax.numpy as jnp
from jax.experimental import pallas as pl
from jax.experimental.pallas import tpu as pltpu


def _layernorm(x, g, b, eps=1e-5):
    mu = jnp.mean(x, axis=-1, keepdims=True)
    var = jnp.mean((x - mu) ** 2, axis=-1, keepdims=True)
    return (x - mu) * jax.lax.rsqrt(var + eps) * g + b


def lana_encoder_kernel(
        x_q_ref, x_kv_ref, pos_ref, maskb_ref,
        wq_ref, bq_ref, wk_ref, bk_ref, wv_ref, bv_ref,
        wo_ref, bo_ref,
        ln1g_ref, ln1b_ref,
        w1_ref, b1_ref, w2_ref, b2_ref,
        ln2g_ref, ln2b_ref,
        o_ref,
        acc_ref, kc_ref, vc_ref,
        *, n_heads, d_k, compute_dtype):
    """Grid = (batch, q_tile, head); head axis accumulates the attention out."""
    qi = pl.program_id(1)
    h = pl.program_id(2)
    cdt = compute_dtype

    @pl.when(h == 0)
    def _init():
        acc_ref[...] = jnp.zeros_like(acc_ref)

    # K/V for this (batch, head) are computed once on the first q-tile and
    # cached in VMEM; later q-tiles of the same batch reuse them.  The (S, D)
    # x_kv load only happens inside this guard.
    @pl.when(qi == 0)
    def _project_kv():
        xkv_c = x_kv_ref[0].astype(cdt)                               # (S, D)
        k = (jnp.dot(xkv_c, wk_ref[0], preferred_element_type=jnp.float32)
             + bk_ref[0, 0])                                          # (S, dk)
        v = (jnp.dot(xkv_c, wv_ref[0], preferred_element_type=jnp.float32)
             + bv_ref[0, 0])                                          # (S, dk)
        kc_ref[h] = k.astype(kc_ref.dtype)
        vc_ref[h] = v.astype(vc_ref.dtype)

    x_q = x_q_ref[0]            # (TQ, D) f32 — query rows (also residual input)
    xq_c = x_q.astype(cdt)

    # Q is scaled once here (O(TQ*d_k)) instead of scaling every (TQ, S) score
    # matrix; the per-head weight slices arrive via BlockSpec so there is no
    # in-kernel lane slicing.
    inv_sqrt_dk = 1.0 / math.sqrt(d_k)
    q = (jnp.dot(xq_c, wq_ref[0], preferred_element_type=jnp.float32)
         + bq_ref[0, 0]) * inv_sqrt_dk                                # (TQ, dk)

    k = kc_ref[h]                                                     # (S, dk)
    v = vc_ref[h]                                                     # (S, dk)

    # scores = q @ k^T via an NT dot_general (no materialized transpose).
    scores = jax.lax.dot_general(
        q.astype(cdt), k,
        dimension_numbers=(((1,), (1,)), ((), ())),
        preferred_element_type=jnp.float32)                           # (TQ, S)
    # Positional bias + precomputed additive mask bias.
    scores = scores + pos_ref[0, 0] + maskb_ref[0]

    scores = scores - jnp.max(scores, axis=-1, keepdims=True)
    e = jnp.exp(scores)
    p = e * pl.reciprocal(jnp.sum(e, axis=-1, keepdims=True), approx=True)

    o_h = jnp.dot(p.astype(cdt), v, preferred_element_type=jnp.float32)
    # Per-head slice of the output projection — lane-dense (TQ, D) accumulate.
    acc_ref[...] += jnp.dot(o_h.astype(cdt), wo_ref[0],
                            preferred_element_type=jnp.float32)

    @pl.when(h == n_heads - 1)
    def _epilogue():
        att = acc_ref[...] + bo_ref[0]
        out1 = _layernorm(x_q + att, ln1g_ref[0], ln1b_ref[0])
        h1 = jnp.dot(out1.astype(cdt), w1_ref[...],
                     preferred_element_type=jnp.float32) + b1_ref[0]
        h1 = jnp.maximum(h1, 0.0)
        ffn = jnp.dot(h1.astype(cdt), w2_ref[...],
                      preferred_element_type=jnp.float32) + b2_ref[0]
        out2 = _layernorm(out1 + ffn, ln2g_ref[0], ln2b_ref[0])
        o_ref[0] = out2.astype(o_ref.dtype)


def _pick_q_tile(seq_len, target=128):
    """Largest q-tile <= target dividing seq_len, keeping the sublane dim a
    multiple of 8 (or the full sequence)."""
    if seq_len <= target:
        return seq_len
    t = (target // 8) * 8
    while t >= 8:
        if seq_len % t == 0:
            return t
        t -= 8
    return seq_len


def _vmem_bytes(shape, dtype):
    """Conservative VMEM footprint of a block: pad to (sublane, 128) tiles."""
    itemsize = jnp.dtype(dtype).itemsize
    if len(shape) >= 2:
        shape = list(shape)
        sub = 8 if itemsize >= 4 else 32 // itemsize
        shape[-2] = -(-shape[-2] // sub) * sub
        shape[-1] = -(-shape[-1] // 128) * 128
    return math.prod(shape) * itemsize


def lana_encoder(x, pos_bias, mask, params, n_heads, *,
                 q_tile=128, compute_dtype=jnp.float32):
    B, S, D = x.shape
    H = n_heads
    d_k = D // H
    F = params["w1"].shape[1]
    TQ = _pick_q_tile(S, q_tile)
    n_q = S // TQ

    x = x.astype(jnp.float32)
    pos_bias = pos_bias.astype(jnp.float32)
    # Fold the boolean mask into an additive bias on the host (one VALU add per
    # head in-kernel, no compare+select).
    mask_bias = jnp.where(mask.astype(bool), jnp.float32(-1e9), jnp.float32(0.0))

    wdt = compute_dtype
    # Pre-split projection weights per head so the kernel never slices along
    # the lane dimension: (H, D, d_k) for Q/K/V, (H, d_k, D) for Wo.
    wq_h = params["wq"].reshape(D, H, d_k).transpose(1, 0, 2).astype(wdt)
    wk_h = params["wk"].reshape(D, H, d_k).transpose(1, 0, 2).astype(wdt)
    wv_h = params["wv"].reshape(D, H, d_k).transpose(1, 0, 2).astype(wdt)
    wo_h = params["wo"].reshape(H, d_k, D).astype(wdt)
    bq_h = params["bq"].reshape(H, 1, d_k).astype(jnp.float32)
    bk_h = params["bk"].reshape(H, 1, d_k).astype(jnp.float32)
    bv_h = params["bv"].reshape(H, 1, d_k).astype(jnp.float32)
    w1 = params["w1"].astype(wdt)
    w2 = params["w2"].astype(wdt)

    grid = (B, n_q, H)

    in_specs = [
        pl.BlockSpec((1, TQ, D), lambda b, qi, h: (b, qi, 0)),        # x (q rows)
        pl.BlockSpec((1, S, D), lambda b, qi, h: (b, 0, 0)),          # x (kv rows)
        pl.BlockSpec((1, 1, TQ, S), lambda b, qi, h: (0, h, qi, 0)),  # pos bias
        pl.BlockSpec((1, TQ, S), lambda b, qi, h: (b, qi, 0)),        # mask bias
        pl.BlockSpec((1, D, d_k), lambda b, qi, h: (h, 0, 0)),        # Wq[h]
        pl.BlockSpec((1, 1, d_k), lambda b, qi, h: (h, 0, 0)),        # bq[h]
        pl.BlockSpec((1, D, d_k), lambda b, qi, h: (h, 0, 0)),        # Wk[h]
        pl.BlockSpec((1, 1, d_k), lambda b, qi, h: (h, 0, 0)),        # bk[h]
        pl.BlockSpec((1, D, d_k), lambda b, qi, h: (h, 0, 0)),        # Wv[h]
        pl.BlockSpec((1, 1, d_k), lambda b, qi, h: (h, 0, 0)),        # bv[h]
        pl.BlockSpec((1, d_k, D), lambda b, qi, h: (h, 0, 0)),        # Wo[h]
        pl.BlockSpec((1, D), lambda b, qi, h: (0, 0)),                # bo
        pl.BlockSpec((1, D), lambda b, qi, h: (0, 0)),                # ln1 gamma
        pl.BlockSpec((1, D), lambda b, qi, h: (0, 0)),                # ln1 beta
        pl.BlockSpec((D, F), lambda b, qi, h: (0, 0)),                # W1
        pl.BlockSpec((1, F), lambda b, qi, h: (0, 0)),                # b1
        pl.BlockSpec((F, D), lambda b, qi, h: (0, 0)),                # W2
        pl.BlockSpec((1, D), lambda b, qi, h: (0, 0)),                # b2
        pl.BlockSpec((1, D), lambda b, qi, h: (0, 0)),                # ln2 gamma
        pl.BlockSpec((1, D), lambda b, qi, h: (0, 0)),                # ln2 beta
    ]
    out_specs = pl.BlockSpec((1, TQ, D), lambda b, qi, h: (b, qi, 0))

    scratch_shapes = [
        pltpu.VMEM((TQ, D), jnp.float32),        # attention-output accumulator
        pltpu.VMEM((H, S, d_k), compute_dtype),  # per-head K cache
        pltpu.VMEM((H, S, d_k), compute_dtype),  # per-head V cache
    ]

    # Explicit VMEM budget derived from tile-padded block sizes
    # (double-buffered blocks + scratch + headroom), clamped below the
    # smallest per-core physical VMEM across v5e/v6e/v7x.
    block_list = [
        ((1, TQ, D), jnp.float32), ((1, S, D), jnp.float32),
        ((1, 1, TQ, S), jnp.float32), ((1, TQ, S), jnp.float32),
        ((1, D, d_k), wdt), ((1, 1, d_k), jnp.float32),
        ((1, D, d_k), wdt), ((1, 1, d_k), jnp.float32),
        ((1, D, d_k), wdt), ((1, 1, d_k), jnp.float32),
        ((1, d_k, D), wdt), ((1, D), jnp.float32),
        ((1, D), jnp.float32), ((1, D), jnp.float32),
        ((D, F), wdt), ((1, F), jnp.float32),
        ((F, D), wdt), ((1, D), jnp.float32),
        ((1, D), jnp.float32), ((1, D), jnp.float32),
        ((1, TQ, D), jnp.float32),               # output block
    ]
    blk = sum(_vmem_bytes(s, d) for s, d in block_list)
    scratch_bytes = (_vmem_bytes((TQ, D), jnp.float32)
                     + 2 * _vmem_bytes((H, S, d_k), compute_dtype)
                     + _vmem_bytes((TQ, F), jnp.float32))   # FFN hidden live range
    vmem_limit = int(min(48 * 2**20,
                         max(16 * 2**20, 2 * blk + scratch_bytes + 8 * 2**20)))

    # Head axis accumulates (output block resident) -> "arbitrary".  The
    # q-tile axis must also be "arbitrary" when the K/V cache is reused across
    # q-tiles (its fill is gated on qi == 0, so it must stay core-local).
    qi_sem = "parallel" if n_q == 1 else "arbitrary"

    kernel = functools.partial(lana_encoder_kernel, n_heads=H, d_k=d_k,
                               compute_dtype=compute_dtype)
    return pl.pallas_call(
        kernel,
        out_shape=jax.ShapeDtypeStruct((B, S, D), jnp.float32),
        grid_spec=pltpu.PrefetchScalarGridSpec(
            num_scalar_prefetch=0,
            grid=grid,
            in_specs=in_specs,
            out_specs=out_specs,
            scratch_shapes=scratch_shapes,
        ),
        compiler_params=pltpu.CompilerParams(
            dimension_semantics=("parallel", qi_sem, "arbitrary"),
            vmem_limit_bytes=vmem_limit),
    )(x, x, pos_bias, mask_bias,
      wq_h, bq_h, wk_h, bk_h, wv_h, bv_h,
      wo_h, params["bo"].astype(jnp.float32),
      params["ln1g"].astype(jnp.float32), params["ln1b"].astype(jnp.float32),
      w1, params["b1"].astype(jnp.float32),
      w2, params["b2"].astype(jnp.float32),
      params["ln2g"].astype(jnp.float32), params["ln2b"].astype(jnp.float32))


def reference(x, pos_bias, mask, params, n_heads):
    """Pure-JAX reference mirroring the PyTorch forward (eval mode)."""
    B, S, D = x.shape
    d_k = D // n_heads

    def lin(a, w, b):
        return a @ w + b[0]

    q = lin(x, params["wq"], params["bq"]).reshape(B, S, n_heads, d_k).transpose(0, 2, 1, 3)
    k = lin(x, params["wk"], params["bk"]).reshape(B, S, n_heads, d_k).transpose(0, 2, 1, 3)
    v = lin(x, params["wv"], params["bv"]).reshape(B, S, n_heads, d_k).transpose(0, 2, 1, 3)

    scores = jnp.einsum("bhqd,bhkd->bhqk", q, k) / math.sqrt(d_k)
    scores = scores + pos_bias
    scores = jnp.where(mask[:, None, :, :].astype(bool), -1e9, scores)
    p = jax.nn.softmax(scores, axis=-1)
    o = jnp.einsum("bhqk,bhkd->bhqd", p, v).transpose(0, 2, 1, 3).reshape(B, S, D)
    att = lin(o, params["wo"], params["bo"])

    out1 = _layernorm(x + att, params["ln1g"][0], params["ln1b"][0])
    ffn = lin(jnp.maximum(lin(out1, params["w1"], params["b1"]), 0.0),
              params["w2"], params["b2"])
    return _layernorm(out1 + ffn, params["ln2g"][0], params["ln2b"][0])


if __name__ == "__main__":
    B, S, D, H, F = 2, 16, 32, 4, 64   # batch, seq, d_model, n_heads, d_ffn

    key = jax.random.PRNGKey(0)
    ks = jax.random.split(key, 16)

    def w(k, shape, scale=0.1):
        return (scale * jax.random.normal(k, shape)).astype(jnp.float32)

    params = {
        "wq": w(ks[0], (D, D)), "bq": w(ks[1], (1, D)),
        "wk": w(ks[2], (D, D)), "bk": w(ks[3], (1, D)),
        "wv": w(ks[4], (D, D)), "bv": w(ks[5], (1, D)),
        "wo": w(ks[6], (D, D)), "bo": w(ks[7], (1, D)),
        "ln1g": jnp.ones((1, D), jnp.float32), "ln1b": jnp.zeros((1, D), jnp.float32),
        "w1": w(ks[8], (D, F)), "b1": w(ks[9], (1, F)),
        "w2": w(ks[10], (F, D)), "b2": w(ks[11], (1, D)),
        "ln2g": jnp.ones((1, D), jnp.float32), "ln2b": jnp.zeros((1, D), jnp.float32),
    }

    x = w(ks[12], (B, S, D), scale=1.0)
    pos_bias = w(ks[13], (1, H, S, S), scale=0.1)
    # Causal-style boolean mask: True means "masked out".
    mask = (jnp.arange(S)[None, :] > jnp.arange(S)[:, None])
    mask = jnp.broadcast_to(mask, (B, S, S))

    ref = reference(x, pos_bias, mask, params, n_heads=H)

    # f32, single q-tile (TQ == S) — strict check (tolerance allows the EUP
    # approx reciprocal).
    out_f32 = jax.block_until_ready(
        lana_encoder(x, pos_bias, mask, params, n_heads=H,
                     compute_dtype=jnp.float32))
    assert out_f32.shape == (B, S, D)
    assert jnp.allclose(out_f32, ref, atol=2e-3, rtol=2e-3), \
        "f32 kernel mismatch vs JAX reference"

    # f32, two q-tiles — exercises the K/V VMEM cache reuse + head accumulation
    # across multiple q-tiles.
    out_f32_t = jax.block_until_ready(
        lana_encoder(x, pos_bias, mask, params, n_heads=H,
                     q_tile=8, compute_dtype=jnp.float32))
    assert jnp.allclose(out_f32_t, ref, atol=2e-3, rtol=2e-3), \
        "f32 tiled kernel mismatch vs JAX reference"

    # bf16-matmul-input path (v5e/v6e MXU throughput) — looser tolerance.
    out_bf16 = jax.block_until_ready(
        lana_encoder(x, pos_bias, mask, params, n_heads=H,
                     q_tile=8, compute_dtype=jnp.bfloat16))
    assert jnp.allclose(out_bf16, ref, atol=5e-2, rtol=5e-2), \
        "bf16 kernel mismatch vs JAX reference"

    print("KERNEL_OK")
</pallas_src>

<mosaic_0001>
module attributes {stable_mosaic.version = 11 : i64} {
  func.func @lana_encoder_kernel(%arg0: i32, %arg1: i32, %arg2: i32, %arg3: memref<1x16x32xf32, #tpu.memory_space<vmem>>, %arg4: memref<1x16x32xf32, #tpu.memory_space<vmem>>, %arg5: memref<1x1x16x16xf32, #tpu.memory_space<vmem>>, %arg6: memref<1x16x16xf32, #tpu.memory_space<vmem>>, %arg7: memref<1x32x8xf32, #tpu.memory_space<vmem>>, %arg8: memref<1x1x8xf32, #tpu.memory_space<vmem>>, %arg9: memref<1x32x8xf32, #tpu.memory_space<vmem>>, %arg10: memref<1x1x8xf32, #tpu.memory_space<vmem>>, %arg11: memref<1x32x8xf32, #tpu.memory_space<vmem>>, %arg12: memref<1x1x8xf32, #tpu.memory_space<vmem>>, %arg13: memref<1x8x32xf32, #tpu.memory_space<vmem>>, %arg14: memref<1x32xf32, #tpu.memory_space<vmem>>, %arg15: memref<1x32xf32, #tpu.memory_space<vmem>>, %arg16: memref<1x32xf32, #tpu.memory_space<vmem>>, %arg17: memref<32x64xf32, #tpu.memory_space<vmem>>, %arg18: memref<1x64xf32, #tpu.memory_space<vmem>>, %arg19: memref<64x32xf32, #tpu.memory_space<vmem>>, %arg20: memref<1x32xf32, #tpu.memory_space<vmem>>, %arg21: memref<1x32xf32, #tpu.memory_space<vmem>>, %arg22: memref<1x32xf32, #tpu.memory_space<vmem>>, %arg23: memref<1x16x32xf32, #tpu.memory_space<vmem>>, %arg24: memref<16x32xf32, #tpu.memory_space<vmem>>, %arg25: memref<4x16x8xf32, #tpu.memory_space<vmem>>, %arg26: memref<4x16x8xf32, #tpu.memory_space<vmem>>) attributes {dimension_semantics = [#tpu.dimension_semantics<parallel>, #tpu.dimension_semantics<parallel>, #tpu.dimension_semantics<arbitrary>], iteration_bounds = array<i64: 2, 1, 4>, scalar_prefetch = 0 : i64, scratch_operands = 3 : i64, tpu.core_type = #tpu.core_type<tc>, window_params = [{transform_indices = @transform_0, window_bounds = array<i64: 1, 16, 32>}, {transform_indices = @transform_1, window_bounds = array<i64: 1, 16, 32>}, {transform_indices = @transform_2, window_bounds = array<i64: 1, 1, 16, 16>}, {transform_indices = @transform_3, window_bounds = array<i64: 1, 16, 16>}, {transform_indices = @transform_4, window_bounds = array<i64: 1, 32, 8>}, {transform_indices = @transform_5, window_bounds = array<i64: 1, 1, 8>}, {transform_indices = @transform_6, window_bounds = array<i64: 1, 32, 8>}, {transform_indices = @transform_7, window_bounds = array<i64: 1, 1, 8>}, {transform_indices = @transform_8, window_bounds = array<i64: 1, 32, 8>}, {transform_indices = @transform_9, window_bounds = array<i64: 1, 1, 8>}, {transform_indices = @transform_10, window_bounds = array<i64: 1, 8, 32>}, {pipeline_mode = #tpu.pipeline_mode<synchronous>, transform_indices = @transform_11, window_bounds = array<i64: 1, 32>}, {pipeline_mode = #tpu.pipeline_mode<synchronous>, transform_indices = @transform_12, window_bounds = array<i64: 1, 32>}, {pipeline_mode = #tpu.pipeline_mode<synchronous>, transform_indices = @transform_13, window_bounds = array<i64: 1, 32>}, {pipeline_mode = #tpu.pipeline_mode<synchronous>, transform_indices = @transform_14, window_bounds = array<i64: 32, 64>}, {pipeline_mode = #tpu.pipeline_mode<synchronous>, transform_indices = @transform_15, window_bounds = array<i64: 1, 64>}, {pipeline_mode = #tpu.pipeline_mode<synchronous>, transform_indices = @transform_16, window_bounds = array<i64: 64, 32>}, {pipeline_mode = #tpu.pipeline_mode<synchronous>, transform_indices = @transform_17, window_bounds = array<i64: 1, 32>}, {pipeline_mode = #tpu.pipeline_mode<synchronous>, transform_indices = @transform_18, window_bounds = array<i64: 1, 32>}, {pipeline_mode = #tpu.pipeline_mode<synchronous>, transform_indices = @transform_19, window_bounds = array<i64: 1, 32>}, {transform_indices = @transform_20, window_bounds = array<i64: 1, 16, 32>}]} {
    %c0_i32 = arith.constant 0 : i32
    %0 = arith.cmpi eq, %arg2, %c0_i32 : i32
    %1 = arith.extui %0 : i1 to i32
    %c0_i32_0 = arith.constant 0 : i32
    %2 = arith.cmpi ne, %1, %c0_i32_0 : i32
    scf.if %2 {
      %cst_36 = arith.constant 0.000000e+00 : f32
      %51 = vector.broadcast %cst_36 : f32 to vector<16x32xf32>
      %c0_37 = arith.constant 0 : index
      %c0_38 = arith.constant 0 : index
      %52 = vector.load %arg24[%c0_37, %c0_38] : memref<16x32xf32, #tpu.memory_space<vmem>>, vector<16x32xf32>
      tpu.vector_store %arg24[%c0_37, %c0_38], %51 {strides = array<i32>} : memref<16x32xf32, #tpu.memory_space<vmem>>, vector<16x32xf32>,
    } else {
    }
    %c0_i32_1 = arith.constant 0 : i32
    %3 = arith.cmpi eq, %arg1, %c0_i32_1 : i32
    %4 = arith.extui %3 : i1 to i32
    %c0_i32_2 = arith.constant 0 : i32
    %5 = arith.cmpi ne, %4, %c0_i32_2 : i32
    scf.if %5 {
      %c0_36 = arith.constant 0 : index
      %c0_37 = arith.constant 0 : index
      %c0_38 = arith.constant 0 : index
      %51 = vector.load %arg4[%c0_36, %c0_37, %c0_38] : memref<1x16x32xf32, #tpu.memory_space<vmem>>, vector<1x16x32xf32>
      %52 = vector.shape_cast %51 : vector<1x16x32xf32> to vector<16x32xf32>
      %c0_39 = arith.constant 0 : index
      %c0_40 = arith.constant 0 : index
      %c0_41 = arith.constant 0 : index
      %53 = vector.load %arg9[%c0_39, %c0_40, %c0_41] : memref<1x32x8xf32, #tpu.memory_space<vmem>>, vector<1x32x8xf32>
      %54 = vector.shape_cast %53 : vector<1x32x8xf32> to vector<32x8xf32>
      %cst_42 = arith.constant dense<0.000000e+00> : vector<16x8xf32>
      %55 = tpu.matmul %52, %54, %cst_42 {dimension_numbers = #tpu.dot_dimension_numbers<[1], [0], [0], [1], [0, 0, 1, 1], [], []>} : vector<16x32xf32>, vector<32x8xf32>, vector<16x8xf32> -> vector<16x8xf32>
      %c0_43 = arith.constant 0 : index
      %c0_44 = arith.constant 0 : index
      %c0_45 = arith.constant 0 : index
      %56 = vector.load %arg10[%c0_43, %c0_44, %c0_45] : memref<1x1x8xf32, #tpu.memory_space<vmem>>, vector<1x1x8xf32>
      %57 = vector.shape_cast %56 : vector<1x1x8xf32> to vector<8xf32>
      %58 = vector.shape_cast %57 : vector<8xf32> to vector<1x8xf32>
      %59 = vector.broadcast %58 : vector<1x8xf32> to vector<16x8xf32>
      %60 = arith.addf %55, %59 : vector<16x8xf32>
      %c0_46 = arith.constant 0 : index
      %c0_47 = arith.constant 0 : index
      %c0_48 = arith.constant 0 : index
      %61 = vector.load %arg11[%c0_46, %c0_47, %c0_48] : memref<1x32x8xf32, #tpu.memory_space<vmem>>, vector<1x32x8xf32>
      %62 = vector.shape_cast %61 : vector<1x32x8xf32> to vector<32x8xf32>
      %cst_49 = arith.constant dense<0.000000e+00> : vector<16x8xf32>
      %63 = tpu.matmul %52, %62, %cst_49 {dimension_numbers = #tpu.dot_dimension_numbers<[1], [0], [0], [1], [0, 0, 1, 1], [], []>} : vector<16x32xf32>, vector<32x8xf32>, vector<16x8xf32> -> vector<16x8xf32>
      %c0_50 = arith.constant 0 : index
      %c0_51 = arith.constant 0 : index
      %c0_52 = arith.constant 0 : index
      %64 = vector.load %arg12[%c0_50, %c0_51, %c0_52] : memref<1x1x8xf32, #tpu.memory_space<vmem>>, vector<1x1x8xf32>
      %65 = vector.shape_cast %64 : vector<1x1x8xf32> to vector<8xf32>
      %66 = vector.shape_cast %65 : vector<8xf32> to vector<1x8xf32>
      %67 = vector.broadcast %66 : vector<1x8xf32> to vector<16x8xf32>
      %68 = arith.addf %63, %67 : vector<16x8xf32>
      %69 = arith.index_cast %arg2 : i32 to index
      %c0_53 = arith.constant 0 : index
      %c0_54 = arith.constant 0 : index
      %70 = vector.load %arg25[%69, %c0_53, %c0_54] : memref<4x16x8xf32, #tpu.memory_space<vmem>>, vector<1x16x8xf32>
      %71 = vector.shape_cast %70 : vector<1x16x8xf32> to vector<16x8xf32>
      %72 = vector.shape_cast %60 : vector<16x8xf32> to vector<1x16x8xf32>
      tpu.vector_store %arg25[%69, %c0_53, %c0_54], %72 {strides = array<i32>} : memref<4x16x8xf32, #tpu.memory_space<vmem>>, vector<1x16x8xf32>,
      %73 = arith.index_cast %arg2 : i32 to index
      %c0_55 = arith.constant 0 : index
      %c0_56 = arith.constant 0 : index
      %74 = vector.load %arg26[%73, %c0_55, %c0_56] : memref<4x16x8xf32, #tpu.memory_space<vmem>>, vector<1x16x8xf32>
      %75 = vector.shape_cast %74 : vector<1x16x8xf32> to vector<16x8xf32>
      %76 = vector.shape_cast %68 : vector<16x8xf32> to vector<1x16x8xf32>
      tpu.vector_store %arg26[%73, %c0_55, %c0_56], %76 {strides = array<i32>} : memref<4x16x8xf32, #tpu.memory_space<vmem>>, vector<1x16x8xf32>,
    } else {
    }
    %c0 = arith.constant 0 : index
    %c0_3 = arith.constant 0 : index
    %c0_4 = arith.constant 0 : index
    %6 = vector.load %arg3[%c0, %c0_3, %c0_4] : memref<1x16x32xf32, #tpu.memory_space<vmem>>, vector<1x16x32xf32>
    %7 = vector.shape_cast %6 : vector<1x16x32xf32> to vector<16x32xf32>
    %c0_5 = arith.constant 0 : index
    %c0_6 = arith.constant 0 : index
    %c0_7 = arith.constant 0 : index
    %8 = vector.load %arg7[%c0_5, %c0_6, %c0_7] : memref<1x32x8xf32, #tpu.memory_space<vmem>>, vector<1x32x8xf32>
    %9 = vector.shape_cast %8 : vector<1x32x8xf32> to vector<32x8xf32>
    %cst = arith.constant dense<0.000000e+00> : vector<16x8xf32>
    %10 = tpu.matmul %7, %9, %cst {dimension_numbers = #tpu.dot_dimension_numbers<[1], [0], [0], [1], [0, 0, 1, 1], [], []>} : vector<16x32xf32>, vector<32x8xf32>, vector<16x8xf32> -> vector<16x8xf32>
    %c0_8 = arith.constant 0 : index
    %c0_9 = arith.constant 0 : index
    %c0_10 = arith.constant 0 : index
    %11 = vector.load %arg8[%c0_8, %c0_9, %c0_10] : memref<1x1x8xf32, #tpu.memory_space<vmem>>, vector<1x1x8xf32>
    %12 = vector.shape_cast %11 : vector<1x1x8xf32> to vector<8xf32>
    %13 = vector.shape_cast %12 : vector<8xf32> to vector<1x8xf32>
    %14 = vector.broadcast %13 : vector<1x8xf32> to vector<16x8xf32>
    %15 = arith.addf %10, %14 : vector<16x8xf32>
    %cst_11 = arith.constant 0.353553385 : f32
    %16 = vector.broadcast %cst_11 : f32 to vector<16x8xf32>
    %17 = arith.mulf %15, %16 : vector<16x8xf32>
    %18 = arith.index_cast %arg2 : i32 to index
    %c0_12 = arith.constant 0 : index
    %c0_13 = arith.constant 0 : index
    %19 = vector.load %arg25[%18, %c0_12, %c0_13] : memref<4x16x8xf32, #tpu.memory_space<vmem>>, vector<1x16x8xf32>
    %20 = vector.shape_cast %19 : vector<1x16x8xf32> to vector<16x8xf32>
    %21 = arith.index_cast %arg2 : i32 to index
    %c0_14 = arith.constant 0 : index
    %c0_15 = arith.constant 0 : index
    %22 = vector.load %arg26[%21, %c0_14, %c0_15] : memref<4x16x8xf32, #tpu.memory_space<vmem>>, vector<1x16x8xf32>
    %23 = vector.shape_cast %22 : vector<1x16x8xf32> to vector<16x8xf32>
    %cst_16 = arith.constant dense<0.000000e+00> : vector<16x16xf32>
    %24 = tpu.matmul %17, %20, %cst_16 {dimension_numbers = #tpu.dot_dimension_numbers<[1], [1], [0], [0], [0, 0, 1, 0], [], []>} : vector<16x8xf32>, vector<16x8xf32>, vector<16x16xf32> -> vector<16x16xf32>
    %c0_17 = arith.constant 0 : index
    %c0_18 = arith.constant 0 : index
    %c0_19 = arith.constant 0 : index
    %c0_20 = arith.constant 0 : index
    %25 = vector.load %arg5[%c0_17, %c0_18, %c0_19, %c0_20] : memref<1x1x16x16xf32, #tpu.memory_space<vmem>>, vector<1x1x16x16xf32>
    %26 = vector.shape_cast %25 : vector<1x1x16x16xf32> to vector<16x16xf32>
    %27 = arith.addf %24, %26 : vector<16x16xf32>
    %c0_21 = arith.constant 0 : index
    %c0_22 = arith.constant 0 : index
    %c0_23 = arith.constant 0 : index
    %28 = vector.load %arg6[%c0_21, %c0_22, %c0_23] : memref<1x16x16xf32, #tpu.memory_space<vmem>>, vector<1x16x16xf32>
    %29 = vector.shape_cast %28 : vector<1x16x16xf32> to vector<16x16xf32>
    %30 = arith.addf %27, %29 : vector<16x16xf32>
    %cst_24 = arith.constant dense<0xFF800000> : vector<16xf32>
    %31 = vector.multi_reduction <maximumf>, %30, %cst_24 [1] : vector<16x16xf32> to vector<16xf32>
    %32 = vector.shape_cast %31 : vector<16xf32> to vector<16x1xf32>
    %33 = vector.broadcast %32 : vector<16x1xf32> to vector<16x16xf32>
    %34 = arith.subf %30, %33 : vector<16x16xf32>
    %35 = math.exp %34 : vector<16x16xf32>
    %cst_25 = arith.constant dense<0.000000e+00> : vector<16xf32>
    %36 = vector.multi_reduction <add>, %35, %cst_25 [1] : vector<16x16xf32> to vector<16xf32>
    %37 = vector.shape_cast %36 : vector<16xf32> to vector<16x1xf32>
    %38 = tpu.reciprocal %37 {approx = true} : vector<16x1xf32> -> vector<16x1xf32>
    %39 = vector.broadcast %38 : vector<16x1xf32> to vector<16x16xf32>
    %40 = arith.mulf %35, %39 : vector<16x16xf32>
    %cst_26 = arith.constant dense<0.000000e+00> : vector<16x8xf32>
    %41 = tpu.matmul %40, %23, %cst_26 {dimension_numbers = #tpu.dot_dimension_numbers<[1], [0], [0], [1], [0, 0, 1, 1], [], []>} : vector<16x16xf32>, vector<16x8xf32>, vector<16x8xf32> -> vector<16x8xf32>
    %c0_27 = arith.constant 0 : index
    %c0_28 = arith.constant 0 : index
    %42 = vector.load %arg24[%c0_27, %c0_28] : memref<16x32xf32, #tpu.memory_space<vmem>>, vector<16x32xf32>
    %c0_29 = arith.constant 0 : index
    %c0_30 = arith.constant 0 : index
    %c0_31 = arith.constant 0 : index
    %43 = vector.load %arg13[%c0_29, %c0_30, %c0_31] : memref<1x8x32xf32, #tpu.memory_space<vmem>>, vector<1x8x32xf32>
    %44 = vector.shape_cast %43 : vector<1x8x32xf32> to vector<8x32xf32>
    %cst_32 = arith.constant dense<0.000000e+00> : vector<16x32xf32>
    %45 = tpu.matmul %41, %44, %cst_32 {dimension_numbers = #tpu.dot_dimension_numbers<[1], [0], [0], [1], [0, 0, 1, 1], [], []>} : vector<16x8xf32>, vector<8x32xf32>, vector<16x32xf32> -> vector<16x32xf32>
    %46 = arith.addf %42, %45 : vector<16x32xf32>
    %c0_33 = arith.constant 0 : index
    %c0_34 = arith.constant 0 : index
    %47 = vector.load %arg24[%c0_33, %c0_34] : memref<16x32xf32, #tpu.memory_space<vmem>>, vector<16x32xf32>
    tpu.vector_store %arg24[%c0_33, %c0_34], %46 {strides = array<i32>} : memref<16x32xf32, #tpu.memory_space<vmem>>, vector<16x32xf32>,
    %c3_i32 = arith.constant 3 : i32
    %48 = arith.cmpi eq, %arg2, %c3_i32 : i32
    %49 = arith.extui %48 : i1 to i32
    %c0_i32_35 = arith.constant 0 : i32
    %50 = arith.cmpi ne, %49, %c0_i32_35 : i32
    scf.if %50 {
      %c0_36 = arith.constant 0 : index
      %c0_37 = arith.constant 0 : index
      %51 = vector.load %arg24[%c0_36, %c0_37] : memref<16x32xf32, #tpu.memory_space<vmem>>, vector<16x32xf32>
      %c0_38 = arith.constant 0 : index
      %c0_39 = arith.constant 0 : index
      %52 = vector.load %arg14[%c0_38, %c0_39] : memref<1x32xf32, #tpu.memory_space<vmem>>, vector<1x32xf32>
      %53 = vector.shape_cast %52 : vector<1x32xf32> to vector<32xf32>
      %54 = vector.shape_cast %53 : vector<32xf32> to vector<1x32xf32>
      %55 = vector.broadcast %54 : vector<1x32xf32> to vector<16x32xf32>
      %56 = arith.addf %51, %55 : vector<16x32xf32>
      %57 = arith.addf %7, %56 : vector<16x32xf32>
      %c0_40 = arith.constant 0 : index
      %c0_41 = arith.constant 0 : index
      %58 = vector.load %arg15[%c0_40, %c0_41] : memref<1x32xf32, #tpu.memory_space<vmem>>, vector<1x32xf32>
      %59 = vector.shape_cast %58 : vector<1x32xf32> to vector<32xf32>
      %c0_42 = arith.constant 0 : index
      %c0_43 = arith.constant 0 : index
      %60 = vector.load %arg16[%c0_42, %c0_43] : memref<1x32xf32, #tpu.memory_space<vmem>>, vector<1x32xf32>
      %61 = vector.shape_cast %60 : vector<1x32xf32> to vector<32xf32>
      %cst_44 = arith.constant dense<0.000000e+00> : vector<16xf32>
      %62 = vector.multi_reduction <add>, %57, %cst_44 [1] : vector<16x32xf32> to vector<16xf32>
      %63 = vector.shape_cast %62 : vector<16xf32> to vector<16x1xf32>
      %cst_45 = arith.constant 3.200000e+01 : f32
      %64 = vector.broadcast %cst_45 : f32 to vector<16x1xf32>
      %65 = arith.divf %63, %64 : vector<16x1xf32>
      %66 = vector.broadcast %65 : vector<16x1xf32> to vector<16x32xf32>
      %67 = arith.subf %57, %66 : vector<16x32xf32>
      %68 = arith.mulf %67, %67 : vector<16x32xf32>
      %cst_46 = arith.constant dense<0.000000e+00> : vector<16xf32>
      %69 = vector.multi_reduction <add>, %68, %cst_46 [1] : vector<16x32xf32> to vector<16xf32>
      %70 = vector.shape_cast %69 : vector<16xf32> to vector<16x1xf32>
      %cst_47 = arith.constant 3.200000e+01 : f32
      %71 = vector.broadcast %cst_47 : f32 to vector<16x1xf32>
      %72 = arith.divf %70, %71 : vector<16x1xf32>
      %73 = vector.broadcast %65 : vector<16x1xf32> to vector<16x32xf32>
      %74 = arith.subf %57, %73 : vector<16x32xf32>
      %cst_48 = arith.constant 9.99999974E-6 : f32
      %75 = vector.broadcast %cst_48 : f32 to vector<16x1xf32>
      %76 = arith.addf %72, %75 : vector<16x1xf32>
      %77 = math.rsqrt %76 : vector<16x1xf32>
      %78 = vector.broadcast %77 : vector<16x1xf32> to vector<16x32xf32>
      %79 = arith.mulf %74, %78 : vector<16x32xf32>
      %80 = vector.shape_cast %59 : vector<32xf32> to vector<1x32xf32>
      %81 = vector.broadcast %80 : vector<1x32xf32> to vector<16x32xf32>
      %82 = arith.mulf %79, %81 : vector<16x32xf32>
      %83 = vector.shape_cast %61 : vector<32xf32> to vector<1x32xf32>
      %84 = vector.broadcast %83 : vector<1x32xf32> to vector<16x32xf32>
      %85 = arith.addf %82, %84 : vector<16x32xf32>
      %c0_49 = arith.constant 0 : index
      %c0_50 = arith.constant 0 : index
      %86 = vector.load %arg17[%c0_49, %c0_50] : memref<32x64xf32, #tpu.memory_space<vmem>>, vector<32x64xf32>
      %cst_51 = arith.constant dense<0.000000e+00> : vector<16x64xf32>
      %87 = tpu.matmul %85, %86, %cst_51 {dimension_numbers = #tpu.dot_dimension_numbers<[1], [0], [0], [1], [0, 0, 1, 1], [], []>} : vector<16x32xf32>, vector<32x64xf32>, vector<16x64xf32> -> vector<16x64xf32>
      %c0_52 = arith.constant 0 : index
      %c0_53 = arith.constant 0 : index
      %88 = vector.load %arg18[%c0_52, %c0_53] : memref<1x64xf32, #tpu.memory_space<vmem>>, vector<1x64xf32>
      %89 = vector.shape_cast %88 : vector<1x64xf32> to vector<64xf32>
      %90 = vector.shape_cast %89 : vector<64xf32> to vector<1x64xf32>
      %91 = vector.broadcast %90 : vector<1x64xf32> to vector<16x64xf32>
      %92 = arith.addf %87, %91 : vector<16x64xf32>
      %cst_54 = arith.constant 0.000000e+00 : f32
      %93 = vector.broadcast %cst_54 : f32 to vector<16x64xf32>
      %94 = arith.maximumf %92, %93 : vector<16x64xf32>
      %c0_55 = arith.constant 0 : index
      %c0_56 = arith.constant 0 : index
      %95 = vector.load %arg19[%c0_55, %c0_56] : memref<64x32xf32, #tpu.memory_space<vmem>>, vector<64x32xf32>
      %cst_57 = arith.constant dense<0.000000e+00> : vector<16x32xf32>
      %96 = tpu.matmul %94, %95, %cst_57 {dimension_numbers = #tpu.dot_dimension_numbers<[1], [0], [0], [1], [0, 0, 1, 1], [], []>} : vector<16x64xf32>, vector<64x32xf32>, vector<16x32xf32> -> vector<16x32xf32>
      %c0_58 = arith.constant 0 : index
      %c0_59 = arith.constant 0 : index
      %97 = vector.load %arg20[%c0_58, %c0_59] : memref<1x32xf32, #tpu.memory_space<vmem>>, vector<1x32xf32>
      %98 = vector.shape_cast %97 : vector<1x32xf32> to vector<32xf32>
      %99 = vector.shape_cast %98 : vector<32xf32> to vector<1x32xf32>
      %100 = vector.broadcast %99 : vector<1x32xf32> to vector<16x32xf32>
      %101 = arith.addf %96, %100 : vector<16x32xf32>
      %102 = arith.addf %85, %101 : vector<16x32xf32>
      %c0_60 = arith.constant 0 : index
      %c0_61 = arith.constant 0 : index
      %103 = vector.load %arg21[%c0_60, %c0_61] : memref<1x32xf32, #tpu.memory_space<vmem>>, vector<1x32xf32>
      %104 = vector.shape_cast %103 : vector<1x32xf32> to vector<32xf32>
      %c0_62 = arith.constant 0 : index
      %c0_63 = arith.constant 0 : index
      %105 = vector.load %arg22[%c0_62, %c0_63] : memref<1x32xf32, #tpu.memory_space<vmem>>, vector<1x32xf32>
      %106 = vector.shape_cast %105 : vector<1x32xf32> to vector<32xf32>
      %cst_64 = arith.constant dense<0.000000e+00> : vector<16xf32>
      %107 = vector.multi_reduction <add>, %102, %cst_64 [1] : vector<16x32xf32> to vector<16xf32>
      %108 = vector.shape_cast %107 : vector<16xf32> to vector<16x1xf32>
      %cst_65 = arith.constant 3.200000e+01 : f32
      %109 = vector.broadcast %cst_65 : f32 to vector<16x1xf32>
      %110 = arith.divf %108, %109 : vector<16x1xf32>
      %111 = vector.broadcast %110 : vector<16x1xf32> to vector<16x32xf32>
      %112 = arith.subf %102, %111 : vector<16x32xf32>
      %113 = arith.mulf %112, %112 : vector<16x32xf32>
      %cst_66 = arith.constant dense<0.000000e+00> : vector<16xf32>
      %114 = vector.multi_reduction <add>, %113, %cst_66 [1] : vector<16x32xf32> to vector<16xf32>
      %115 = vector.shape_cast %114 : vector<16xf32> to vector<16x1xf32>
      %cst_67 = arith.constant 3.200000e+01 : f32
      %116 = vector.broadcast %cst_67 : f32 to vector<16x1xf32>
      %117 = arith.divf %115, %116 : vector<16x1xf32>
      %118 = vector.broadcast %110 : vector<16x1xf32> to vector<16x32xf32>
      %119 = arith.subf %102, %118 : vector<16x32xf32>
      %cst_68 = arith.constant 9.99999974E-6 : f32
      %120 = vector.broadcast %cst_68 : f32 to vector<16x1xf32>
      %121 = arith.addf %117, %120 : vector<16x1xf32>
      %122 = math.rsqrt %121 : vector<16x1xf32>
      %123 = vector.broadcast %122 : vector<16x1xf32> to vector<16x32xf32>
      %124 = arith.mulf %119, %123 : vector<16x32xf32>
      %125 = vector.shape_cast %104 : vector<32xf32> to vector<1x32xf32>
      %126 = vector.broadcast %125 : vector<1x32xf32> to vector<16x32xf32>
      %127 = arith.mulf %124, %126 : vector<16x32xf32>
      %128 = vector.shape_cast %106 : vector<32xf32> to vector<1x32xf32>
      %129 = vector.broadcast %128 : vector<1x32xf32> to vector<16x32xf32>
      %130 = arith.addf %127, %129 : vector<16x32xf32>
      %c0_69 = arith.constant 0 : index
      %c0_70 = arith.constant 0 : index
      %c0_71 = arith.constant 0 : index
      %131 = vector.load %arg23[%c0_69, %c0_70, %c0_71] : memref<1x16x32xf32, #tpu.memory_space<vmem>>, vector<1x16x32xf32>
      %132 = vector.shape_cast %131 : vector<1x16x32xf32> to vector<16x32xf32>
      %133 = vector.shape_cast %130 : vector<16x32xf32> to vector<1x16x32xf32>
      tpu.vector_store %arg23[%c0_69, %c0_70, %c0_71], %133 {strides = array<i32>} : memref<1x16x32xf32, #tpu.memory_space<vmem>>, vector<1x16x32xf32>,
    } else {
    }
    return
  }
  func.func @transform_0(%arg0: i32, %arg1: i32, %arg2: i32) -> (i32, i32, i32) {
    %c0_i32 = arith.constant 0 : i32
    %c0_i32_0 = arith.constant 0 : i32
    return %arg0, %arg1, %c0_i32 : i32, i32, i32
  }
  func.func @transform_1(%arg0: i32, %arg1: i32, %arg2: i32) -> (i32, i32, i32) {
    %c0_i32 = arith.constant 0 : i32
    %c0_i32_0 = arith.constant 0 : i32
    %c0_i32_1 = arith.constant 0 : i32
    return %arg0, %c0_i32, %c0_i32_0 : i32, i32, i32
  }
  func.func @transform_2(%arg0: i32, %arg1: i32, %arg2: i32) -> (i32, i32, i32, i32) {
    %c0_i32 = arith.constant 0 : i32
    %c0_i32_0 = arith.constant 0 : i32
    %c0_i32_1 = arith.constant 0 : i32
    return %c0_i32, %arg2, %arg1, %c0_i32_0 : i32, i32, i32, i32
  }
  func.func @transform_3(%arg0: i32, %arg1: i32, %arg2: i32) -> (i32, i32, i32) {
    %c0_i32 = arith.constant 0 : i32
    %c0_i32_0 = arith.constant 0 : i32
    return %arg0, %arg1, %c0_i32 : i32, i32, i32
  }
  func.func @transform_4(%arg0: i32, %arg1: i32, %arg2: i32) -> (i32, i32, i32) {
    %c0_i32 = arith.constant 0 : i32
    %c0_i32_0 = arith.constant 0 : i32
    %c0_i32_1 = arith.constant 0 : i32
    return %arg2, %c0_i32, %c0_i32_0 : i32, i32, i32
  }
  func.func @transform_5(%arg0: i32, %arg1: i32, %arg2: i32) -> (i32, i32, i32) {
    %c0_i32 = arith.constant 0 : i32
    %c0_i32_0 = arith.constant 0 : i32
    %c0_i32_1 = arith.constant 0 : i32
    return %arg2, %c0_i32, %c0_i32_0 : i32, i32, i32
  }
  func.func @transform_6(%arg0: i32, %arg1: i32, %arg2: i32) -> (i32, i32, i32) {
    %c0_i32 = arith.constant 0 : i32
    %c0_i32_0 = arith.constant 0 : i32
    %c0_i32_1 = arith.constant 0 : i32
    return %arg2, %c0_i32, %c0_i32_0 : i32, i32, i32
  }
  func.func @transform_7(%arg0: i32, %arg1: i32, %arg2: i32) -> (i32, i32, i32) {
    %c0_i32 = arith.constant 0 : i32
    %c0_i32_0 = arith.constant 0 : i32
    %c0_i32_1 = arith.constant 0 : i32
    return %arg2, %c0_i32, %c0_i32_0 : i32, i32, i32
  }
  func.func @transform_8(%arg0: i32, %arg1: i32, %arg2: i32) -> (i32, i32, i32) {
    %c0_i32 = arith.constant 0 : i32
    %c0_i32_0 = arith.constant 0 : i32
    %c0_i32_1 = arith.constant 0 : i32
    return %arg2, %c0_i32, %c0_i32_0 : i32, i32, i32
  }
  func.func @transform_9(%arg0: i32, %arg1: i32, %arg2: i32) -> (i32, i32, i32) {
    %c0_i32 = arith.constant 0 : i32
    %c0_i32_0 = arith.constant 0 : i32
    %c0_i32_1 = arith.constant 0 : i32
    return %arg2, %c0_i32, %c0_i32_0 : i32, i32, i32
  }
  func.func @transform_10(%arg0: i32, %arg1: i32, %arg2: i32) -> (i32, i32, i32) {
    %c0_i32 = arith.constant 0 : i32
    %c0_i32_0 = arith.constant 0 : i32
    %c0_i32_1 = arith.constant 0 : i32
    return %arg2, %c0_i32, %c0_i32_0 : i32, i32, i32
  }
  func.func @transform_11(%arg0: i32, %arg1: i32, %arg2: i32) -> (i32, i32) {
    %c0_i32 = arith.constant 0 : i32
    %c0_i32_0 = arith.constant 0 : i32
    %c0_i32_1 = arith.constant 0 : i32
    return %c0_i32, %c0_i32_0 : i32, i32
  }
  func.func @transform_12(%arg0: i32, %arg1: i32, %arg2: i32) -> (i32, i32) {
    %c0_i32 = arith.constant 0 : i32
    %c0_i32_0 = arith.constant 0 : i32
    %c0_i32_1 = arith.constant 0 : i32
    return %c0_i32, %c0_i32_0 : i32, i32
  }
  func.func @transform_13(%arg0: i32, %arg1: i32, %arg2: i32) -> (i32, i32) {
    %c0_i32 = arith.constant 0 : i32
    %c0_i32_0 = arith.constant 0 : i32
    %c0_i32_1 = arith.constant 0 : i32
    return %c0_i32, %c0_i32_0 : i32, i32
  }
  func.func @transform_14(%arg0: i32, %arg1: i32, %arg2: i32) -> (i32, i32) {
    %c0_i32 = arith.constant 0 : i32
    %c0_i32_0 = arith.constant 0 : i32
    %c0_i32_1 = arith.constant 0 : i32
    return %c0_i32, %c0_i32_0 : i32, i32
  }
  func.func @transform_15(%arg0: i32, %arg1: i32, %arg2: i32) -> (i32, i32) {
    %c0_i32 = arith.constant 0 : i32
    %c0_i32_0 = arith.constant 0 : i32
    %c0_i32_1 = arith.constant 0 : i32
    return %c0_i32, %c0_i32_0 : i32, i32
  }
  func.func @transform_16(%arg0: i32, %arg1: i32, %arg2: i32) -> (i32, i32) {
    %c0_i32 = arith.constant 0 : i32
    %c0_i32_0 = arith.constant 0 : i32
    %c0_i32_1 = arith.constant 0 : i32
    return %c0_i32, %c0_i32_0 : i32, i32
  }
  func.func @transform_17(%arg0: i32, %arg1: i32, %arg2: i32) -> (i32, i32) {
    %c0_i32 = arith.constant 0 : i32
    %c0_i32_0 = arith.constant 0 : i32
    %c0_i32_1 = arith.constant 0 : i32
    return %c0_i32, %c0_i32_0 : i32, i32
  }
  func.func @transform_18(%arg0: i32, %arg1: i32, %arg2: i32) -> (i32, i32) {
    %c0_i32 = arith.constant 0 : i32
    %c0_i32_0 = arith.constant 0 : i32
    %c0_i32_1 = arith.constant 0 : i32
    return %c0_i32, %c0_i32_0 : i32, i32
  }
  func.func @transform_19(%arg0: i32, %arg1: i32, %arg2: i32) -> (i32, i32) {
    %c0_i32 = arith.constant 0 : i32
    %c0_i32_0 = arith.constant 0 : i32
    %c0_i32_1 = arith.constant 0 : i32
    return %c0_i32, %c0_i32_0 : i32, i32
  }
  func.func @transform_20(%arg0: i32, %arg1: i32, %arg2: i32) -> (i32, i32, i32) {
    %c0_i32 = arith.constant 0 : i32
    %c0_i32_0 = arith.constant 0 : i32
    return %arg0, %arg1, %c0_i32 : i32, i32, i32
  }
}

</mosaic_0001>

<bundles_post_ra>
// kernel: tpu_custom_call.1
= control target key start
LH: loop header
LB: loop body
LE: loop exit
PB: predicated region body
PF: predicated region fallthrough
CT: control target
= control target key end

     0   :  { %s2880_s0 = inlined_call_operand.vmem [shape: f32[2,16,32], index: 0, kind: input, shape index: {}]   ;;  %s2881_s1 = inlined_call_operand.vmem [shape: f32[2,16,32], index: 1, kind: input, shape index: {}]   ;;  %s2882_s2 = inlined_call_operand.vmem [shape: f32[1,4,16,16], index: 2, kind: input, shape index: {}]   ;;  %s2883_s3 = inlined_call_operand.vmem [shape: f32[2,16,16], index: 3, kind: input, shape index: {}]   ;;  %s2884_s4 = inlined_call_operand.vmem [shape: f32[4,32,8], index: 4, kind: input, shape index: {}]   ;;  %s2885_s5 = inlined_call_operand.vmem [shape: f32[4,1,8], index: 5, kind: input, shape index: {}]   ;;  %s2886_s6 = inlined_call_operand.vmem [shape: f32[4,32,8], index: 6, kind: input, shape index: {}]   ;;  %s2887_s7 = inlined_call_operand.vmem [shape: f32[4,1,8], index: 7, kind: input, shape index: {}]   ;;  %s2888_s8 = inlined_call_operand.vmem [shape: f32[4,32,8], index: 8, kind: input, shape index: {}]   ;;  %s2889_s9 = inlined_call_operand.vmem [shape: f32[4,1,8], index: 9, kind: input, shape index: {}]   ;;  %s2890_s10 = inlined_call_operand.vmem [shape: f32[4,8,32], index: 10, kind: input, shape index: {}]   ;;  %s2891_s11 = inlined_call_operand.vmem [shape: f32[1,32], index: 11, kind: input, shape index: {}]   ;;  %s2892_s12 = inlined_call_operand.vmem [shape: f32[1,32], index: 12, kind: input, shape index: {}]   ;;  %s2893_s13 = inlined_call_operand.vmem [shape: f32[1,32], index: 13, kind: input, shape index: {}]   ;;  %s2894_s14 = inlined_call_operand.vmem [shape: f32[32,64], index: 14, kind: input, shape index: {}]   ;;  %s2895_s15 = inlined_call_operand.vmem [shape: f32[1,64], index: 15, kind: input, shape index: {}]   ;;  %s2896_s16 = inlined_call_operand.vmem [shape: f32[64,32], index: 16, kind: input, shape index: {}]   ;;  %s2897_s17 = inlined_call_operand.vmem [shape: f32[1,32], index: 17, kind: input, shape index: {}]   ;;  %s2898_s18 = inlined_call_operand.vmem [shape: f32[1,32], index: 18, kind: input, shape index: {}]   ;;  %s2899_s19 = inlined_call_operand.vmem [shape: f32[1,32], index: 19, kind: input, shape index: {}]   ;;  %s2900_s20 = inlined_call_operand.hbm [shape: f32[2,16,32], index: 20, kind: output, shape index: {}]  }
   0x1   :  { %2917 = sst [smem:[#allocation20_spill]] %s2880_s0 }
   0x2   :  { %2918 = sst [smem:[#allocation21_spill]] %s2881_s1 }
   0x3   :  { %2919 = sst [smem:[#allocation22_spill]] %s2882_s2 }
   0x4   :  { %2920 = sst [smem:[#allocation23_spill]] %s2883_s3 }
   0x5   :  { %2921 = sst [smem:[#allocation24_spill]] %s2884_s4 }
   0x6   :  { %2922 = sst [smem:[#allocation25_spill]] %s2891_s11 }
   0x7   :  { %2923 = sst [smem:[#allocation26_spill]] %s2892_s12 }
   0x8   :  { %2924 = sst [smem:[#allocation27_spill]] %s2893_s13 }
   0x9   :  { %2925 = sst [smem:[#allocation28_spill]] %s2894_s14 }
   0xa   :  { %2926 = sst [smem:[#allocation29_spill]] %s2895_s15 }
   0xb   :  { %2927 = sst [smem:[#allocation30_spill]] %s2896_s16 }
   0xc   :  { %2928 = sst [smem:[#allocation31_spill]] %s2897_s17 }
   0xd   :  { %2929 = sst [smem:[#allocation32_spill]] %s2898_s18 }
   0xe   :  { %2930 = sst [smem:[#allocation33_spill]] %s2899_s19 }
   0xf   :  { %2931 = sst [smem:[#allocation34_spill]] %s2900_s20 }
  0x10   :  { %25 = vsyncpa [#allocation6], 0 }
  0x11   :  { %27 = vsyncpa [#allocation6 + $0x1], 0  ;;  %s2546_s1 = smov 0   ;;  %s2548_s22 = smov 0  }
  0x12   :  { %s2550_s23 = smov 0   ;;  %s2552_s24 = smov 0  }
  0x13   :  { %s2554_s2 = smov 0   ;;  %s2556_s25 = smov 0  }
  0x14   :  { %s2558_s3 = smov 0   ;;  %s2560_s26 = smov 0  }
  0x15 LB: > { %2932 = sst [smem:[#allocation8_spill]] %s2407_s1  ;;  %s2000_s27 = sadd.s32 4294967295, %s2435_s26   ;;  %s2435_s26 = sphi %s2560_s26, %s33_s26   ;;  %s2431_s3 = sphi %s2558_s3, %s2975_s3   ;;  %s2427_s25 = sphi %s2556_s25, %s2974_s25   ;;  %s2423_s2 = sphi %s2554_s2, %s2973_s2   ;;  %s2419_s24 = sphi %s2552_s24, %s2972_s24   ;;  %s2415_s23 = sphi %s2550_s23, %s2971_s23   ;;  %s2411_s22 = sphi %s2548_s22, %s2970_s22   ;;  %s2407_s1 = sphi %s2546_s1, %s2969_s1  }
  0x16   : > { %2933 = sst [smem:[#allocation9_spill]] %s2411_s22  ;;  %s2001_s28 = sadd.s32 4294967294, %s2435_s26  }
  0x17   : > { %2934 = sst [smem:[#allocation10_spill]] %s2415_s23  ;;  %s45_s4 = sadd.s32 1, %s2427_s25 }
  0x18   : > { %2935 = sst [smem:[#allocation11_spill]] %s2423_s2  ;;  %p46_p0 = scmp.ge.s32.totalorder %s45_s4, 4 }
  0x19   : > { %2936 = sst [smem:[#allocation12_spill]] %s2427_s25  ;;  %s52_s29 = sadd.s32 1, %s2431_s3 }
  0x1a   : > { %2937 = sst [smem:[#allocation13_spill]] %s2431_s3  ;;  %p552_p1 = scmp.ne.s32.totalorder %s2415_s23, %s2411_s22 }
  0x1b   : > { %2938 = sst [smem:[#allocation14_spill]] %s2435_s26  ;;  %p553_p2 = scmp.eq.s32.totalorder %s2000_s27, 7 }
  0x1c   : > { %s2977_s4 = smov (%p46_p0, %s45_s4), 0  ;;  %s2979_s29 = smov (!%p46_p0, %s52_s29), %s2431_s3 }
  0x1d   : > { %2939 = sst [smem:[#allocation15_spill]] %s2977_s4  ;;  %p2595_p3 = por %p553_p2, %p552_p1 }
  0x1e   : > { %p558_p4 = scmp.ne.s32.totalorder %s2411_s22, %s2407_s1  ;;  %p54_p5 = scmp.ge.s32.totalorder %s2979_s29, 2 }
  0x1f   : > { %s2940_s30 = scalar_select %p2595_p3, 1, 0 }
  0x20   : > { %p559_p6 = scmp.eq.s32.totalorder %s2001_s28, 7  ;;  %p2004_p7 = scmp.ge.s32.totalorder %s2435_s26, 1 }
  0x21   : > { %2941 = sst [smem:[#allocation16_spill]] %s2940_s30  ;;  %p700_p8 = scmp.lt.s32.totalorder %s2435_s26, 9 }
  0x22   : > { %s2981_s29 = smov (%p54_p5, %s2979_s29), 0  ;;  %p2605_p9 = por %p559_p6, %p558_p4 }
  0x23   : > { %2942 = sst [smem:[#allocation17_spill]] %s2981_s29  ;;  %p701_p10 = pnand %p2004_p7, %p700_p8 }
  0x24   : > { %s2943_s0 = scalar_select %p2605_p9, 1, 0 }
  0x25   : > { %s537_s21 = ssub.s32 %s2431_s3, %s2981_s29  ;;  %s542_s27 = sadd.s32 1, %s2415_s23 }
  0x26   : > { %2944 = sst [smem:[#allocation18_spill]] %s2943_s0  ;;  %p540_p11 = scmp.eq.s32.totalorder %s537_s21, 0 }
  0x27   : > { %704 = sbr.rel (%p701_p10) target bundleno = 2375 (0x947), region = 100  ;;  %s2910_s28 = sand.u32 (!%p701_p10), 1, %s2411_s22  }
  0x28   : > { %s2613_s4 = scalar_select %p540_p11, %s2415_s23, %s542_s27  }
  0x29   : > { %p814_p12 = scmp.lt.s32.totalorder (!%p701_p10), %s2423_s2, 1  ;;  %s2005_s25 = sshll.u32 (!%p701_p10), %s2910_s28, 4 }
  0x2a   : > { %2945 = sst [smem:[#allocation19_spill]] %s2613_s4  ;;  %p829_p13 = scmp.lt.s32.totalorder (!%p701_p10), %s2419_s24, 3 }
  0x2b   : > { %s2946_s3 = sld [smem:[#allocation20_spill]] (!%p701_p10)  ;;  %s2947_s20 = sld [smem:[#allocation21_spill]] (!%p701_p10) }
  0x2c   : > { %s2948_s19 = sld [smem:[#allocation23_spill]] (!%p701_p10)  ;;  %s2949_s13 = sld [smem:[#allocation22_spill]] (!%p701_p10) }
  0x2d   : > { %s2950_s27 = sld [smem:[#allocation24_spill]] (!%p701_p10)  ;;  %s2677_s11 = scalar_lea.vmem (!%p701_p10), [#allocation5], %s2005_s25 }
  0x2e   : > { %s815_s1 = scalar_select %p814_p12, %s2423_s2, 1 }
  0x2f   : > { %s2622_s0 = scalar_select %p829_p13, %s2419_s24, 3 }
  0x30   : > { %s2058_s21 = sshll.u32 %s815_s1, 4  ;;  %p2021_p0 = scmp.ne.s32.totalorder %s2419_s24, 0 }
  0x31   : > { %s2627_s4 = scalar_lea.vmem %s2946_s3, %s2058_s21  ;;  %s2632_s28 = scalar_lea.vmem %s2947_s20, %s2058_s21  ;;  %vm881_vm0 = vcmask (!%p2021_p0), 261120   ;;  %v2437_v0 = vmov (!%p2021_p0), 0.0  }
  0x32   : > { %s2060_s30 = sshll.u32 %s2622_s0, 4  ;;  %s2638_s18 = scalar_lea.vmem %s2948_s19, %s2058_s21  ;;  %882 = vst.msk [vmem:[#allocation2] sm:$0xff] (!%p2021_p0), %vm881_vm0, %v2437_v0  ;;  %883 = vst.msk [vmem:[#allocation2 + $0x8] sm:$0xff] (!%p2021_p0), %vm881_vm0, %v2437_v0 }
  0x33   : > { %s2643_s1 = scalar_lea.vmem %s2949_s13, %s2060_s30  ;;  %s2062_s12 = sshll.u32 %s2622_s0, 5 }
  0x34   : > { %s2649_s16 = scalar_lea.vmem %s2950_s27, %s2062_s12  ;;  %s860_s19 = scalar_lea.vmem %s2886_s6, %s2062_s12 }
  0x35   : > { %s863_s15 = scalar_lea.vmem %s2887_s7, %s2622_s0  ;;  %s2665_s30 = scalar_lea.vmem %s2888_s8, %s2062_s12 }
  0x36   : > { %s871_s3 = scalar_lea.vmem %s2889_s9, %s2622_s0  ;;  %s2020_s27 = sshll.u32 %s2622_s0, 3 }
  0x37   : > { %s2675_s26 = scalar_lea.vmem %s2890_s10, %s2020_s27  ;;  %880 = sbr.rel (%p2021_p0) target bundleno = 62 (0x3e), region = 104 }
  0x3e PF: > { %v890_v1 = vld [vmem:[%s860_s19] sm:$0xff]  ;;  %v891_v2 = vld [vmem:[%s860_s19 + $0x8] sm:$0xff]  ;;  %v892_v3 = vld [vmem:[%s860_s19 + $0x10] sm:$0xff]  ;;  %vm901_vm1 = vcmask 261120   ;;  %s2028_s12 = sshll.u32 %s2419_s24, 4  ;;  %vm1071_vm2 = vcmask 64512  }
  0x3f   : > { %v2193_v4 = vpack.c.bf16 %v891_v2, %v890_v1  ;;  %v893_v5 = vld [vmem:[%s860_s19 + $0x18] sm:$0xff]  ;;  %v888_v6 = vld [vmem:[%s2632_s28] sm:$0xff]  ;;  %v1080_v9 = vld [vmem:[%s2649_s16 + $0x8] sm:$0xff]  ;;  %s1070_s25 = scalar_lea.vmem [#allocation3], %s2028_s12  ;;  %s2951_s19 = scalar_lea.vmem %s2885_s5, %s2622_s0  ;;  %vm1275_vm4 = vcmask 130048  }
  0x40   : > { %v2197_v7 = vpack.c.bf16 %v893_v5, %v892_v3  ;;  %2119 = vmatprep.mubr.msk.f32.mxu0 %vm901_vm1, %v888_v6  ;;  %v1079_v8 = vld [vmem:[%s2649_s16] sm:$0xff]  ;;  %2130 = vmatprep.mubr.msk.f32.mxu1 %vm901_vm1, %v888_v6  ;;  %v1081_v11 = vld [vmem:[%s2649_s16 + $0x10] sm:$0xff]  ;;  %v1082_v12 = vld [vmem:[%s2649_s16 + $0x18] sm:$0xff]  ;;  %p2041_p1 = scmp.ne.s32.totalorder %s2419_s24, 3 }
  0x41   : > { %2194 = vmatprep.subr.bf16.mxu0 %v2193_v4  ;;  %v2209_v10 = vpack.c.bf16 %v1080_v9, %v1079_v8  ;;  %v889_v13 = vld [vmem:[%s2632_s28 + $0x8] sm:$0xff]  ;;  %v2213_v14 = vpack.c.bf16 %v1082_v12, %v1081_v11  ;;  %v2689_v15 = vld [vmem:[%s2627_s4] sm:$0xff]  ;;  %v985_v20 = vld [vmem:[%s2665_s30 + $0x10] sm:$0xff]  ;;  %s2953_s13 = sld [smem:[#allocation28_spill]] (!%p2041_p1)  ;;  %s2955_s24 = sld [smem:[#allocation26_spill]] (!%p2041_p1)  ;;  %vm1638_vm5 = vcmask (!%p2041_p1), 523264  }
  0x42   : > { %2196 = vmatpush3.bf16.msra.mxu0 %v2193_v4  ;;  %v2695_v16 = vld [vmem:[%s2627_s4 + $0x8] sm:$0xff]  ;;  %v983_v17 = vld [vmem:[%s2665_s30] sm:$0xff]  ;;  %v986_v21 = vld [vmem:[%s2665_s30 + $0x18] sm:$0xff]  ;;  %s2957_s14 = sld [smem:[#allocation29_spill]] (!%p2041_p1)  ;;  %s2958_s4 = sld [smem:[#allocation31_spill]] (!%p2041_p1) }
  0x43   : > { %2198 = vmatprep.subr.bf16.mxu0 %v2197_v7  ;;  %v984_v18 = vld [vmem:[%s2665_s30 + $0x8] sm:$0xff]  ;;  %v2205_v22 = vpack.c.bf16 %v986_v21, %v985_v20  ;;  %v2022_v23 = vld [vmem:[%s863_s15] ss:$0 sm:$0xff]  ;;  %vm2218_vm3 = vmpackc.low %vm1071_vm2, %vm1071_vm2  ;;  %s1074_s15 = scalar_lea.vmem [#allocation4], %s2028_s12  ;;  %s2954_s12 = sld [smem:[#allocation30_spill]] (!%p2041_p1) }
  0x44   : > { %v2201_v19 = vpack.c.bf16 %v984_v18, %v983_v17  ;;  %v2029_v28 = vld [vmem:[%s2951_s19] ss:$0 sm:$0xff]  ;;  %v1182_v46 = vld [vmem:[%s2643_s1 + $0x8] sm:$0xff]  ;;  %s2956_s30 = sld [smem:[#allocation27_spill]] (!%p2041_p1)  ;;  %s2959_s22 = sld [smem:[#allocation32_spill]] (!%p2041_p1) }
  0x45   : > { %v2025_v38 = vld [vmem:[%s871_s3] ss:$0 sm:$0xff]  ;;  %v1272_v53 = vld [vmem:[%s2638_s18 + $0x8] sm:$0xff] }
  0x46   : > { %2200 = vmatpush3.bf16.msra.mxu0 %v2197_v7  ;;  %2202 = vmatprep.subr.bf16.mxu1 %v2201_v19  ;;  %v1181_v47 = vld [vmem:[%s2643_s1] sm:$0xff]  ;;  %s2952_s1 = sld [smem:[#allocation25_spill]] (!%p2041_p1) }
  0x47   : > { %2210 = vmatprep.subr.bf16.mxu0 %v2209_v10  ;;  %2204 = vmatpush3.bf16.msra.mxu1 %v2201_v19  ;;  %v1271_v50 = vld [vmem:[%s2638_s18] sm:$0xff]  ;;  %s2960_s18 = sld [smem:[#allocation33_spill]] (!%p2041_p1) }
  0x48   : > { %2206 = vmatprep.subr.bf16.mxu1 %v2205_v22  ;;  %v1381_v4 = vld [vmem:[%s2675_s26] sm:$0xff] }
  0x49   : > { %2120 = vmatmul.mubr.msk.f32.vlgmr.msra.gmra.mrb[0].mxu0 %vm901_vm1, %v889_v13 }
  0x4a   : > { %2212 = vmatpush3.bf16.msra.mxu0 %v2209_v10  ;;  %2141 = vmatprep.mubr.msk.f32.mxu0 %vm901_vm1, %v2689_v15 }
  0x4b   : > { %2214 = vmatprep.subr.bf16.mxu0 %v2213_v14  ;;  %2208 = vmatpush3.bf16.msra.mxu1 %v2205_v22 }
  0x4c   : > { %v2042_v22 = vld [vmem:[%s2952_s1] ss:$0 sm:$0xff] (!%p2041_p1) }
  0x4e   : > { %2216 = vmatpush3.bf16.msra.mxu0 %v2213_v14  ;;  %2131 = vmatmul.mubr.msk.f32.vlgmr.msra.gmra.mrb[0].mxu1 %vm901_vm1, %v889_v13  ;;  %v1380_v13 = vld [vmem:[#allocation2 + $0x8] sm:$0xff]  ;;  %v1379_v14 = vld [vmem:[#allocation2] sm:$0xff] }
  0x51   : > { %2142 = vmatmul.mubr.msk.f32.vlgmr.msra.gmra.mrb[2].mxu0 %vm901_vm1, %v2695_v16 }
 0x11c   : > { %v2121_v24 = vpop.f32.mrb[0].mxu0 }
 0x11d   : > { %v980_v25 = vadd.f32 %v2121_v24, %v2022_v23  ;;  %v974_v26 = vpop.f32.mrb[1].mxu0 }
 0x11e   : > { %v975_v27 = vadd.f32 %v2022_v23, %v974_v26 }
 0x11f   : > { %1073 = vst.msk [vmem:[%s1070_s25 + $0x8] sm:$0xff] %vm1071_vm2, %v980_v25 }
 0x120   : > { %1072 = vst.msk [vmem:[%s1070_s25] sm:$0xff] %vm1071_vm2, %v975_v27 }
 0x121   : > { %v2132_v39 = vpop.f32.mrb[0].mxu1 }
 0x122   : > { %v1066_v40 = vadd.f32 %v2132_v39, %v2025_v38  ;;  %v1060_v41 = vpop.f32.mrb[1].mxu1  ;;  %v1530_v39 = vld [vmem:[%s2953_s13 + $0x8] sm:$0xff] (!%p2041_p1) }
 0x123   : > { %v1061_v42 = vadd.f32 %v2025_v38, %v1060_v41 }
 0x124   : > { %v2143_v29 = vpop.f32.mrb[2].mxu0  ;;  %1076 = vst.msk [vmem:[%s1074_s15 + $0x8] sm:$0xff] %vm1071_vm2, %v1066_v40  ;;  %v1531_v40 = vld [vmem:[%s2953_s13 + $0x10] sm:$0xff] (!%p2041_p1) }
 0x125   : > { %v1163_v30 = vpop.f32.mrb[3].mxu0  ;;  %v1169_v36 = vadd.f32 %v2143_v29, %v2029_v28  ;;  %1075 = vst.msk [vmem:[%s1074_s15] sm:$0xff] %vm1071_vm2, %v1061_v42  ;;  %v1532_v42 = vld [vmem:[%s2953_s13 + $0x18] sm:$0xff] (!%p2041_p1) }
 0x126   : > { %v1177_v31 = vld [vmem:[%s1070_s25 + $0x8] sm:$0xff]  ;;  %v1164_v32 = vadd.f32 %v2029_v28, %v1163_v30 }
 0x127   : > { %v1176_v33 = vld [vmem:[%s1070_s25] sm:$0xff]  ;;  %v1173_v37 = vmul.f32 0.35355338, %v1169_v36 }
 0x128   : > { %v2217_v34 = vpack.c.bf16 %v1177_v31, %v1176_v33  ;;  %v1172_v35 = vmul.f32 0.35355338, %v1164_v32 }
 0x12a   : > { %2219 = vmatprep.subr.msk.bf16.mxu1 %vm2218_vm3, %v2217_v34  ;;  %2148 = vmatprep.mubr.msk.f32.mxu1 %vm1071_vm2, %v1172_v35 }
 0x12b   : > { %2222 = vmatpush3.bf16.xpose.msk.msra.mxu1 %vm2218_vm3, %v2217_v34  ;;  %v1180_v44 = vld [vmem:[%s1074_s15 + $0x8] sm:$0xff] }
 0x12c   : > { %v1179_v43 = vld [vmem:[%s1074_s15] sm:$0xff]  ;;  %2158 = vmatprep.subr.mxu1 %v1381_v4 }
 0x12d   : > { %v2223_v45 = vpack.c.bf16 %v1180_v44, %v1179_v43  ;;  %v2231_v43 = vpack.c.bf16 (!%p2041_p1), %v1532_v42, %v1531_v40  ;;  %v1623_v44 = vld [vmem:[%s2954_s12] sm:$0xff] (!%p2041_p1) }
 0x12f   : > { %2224 = vmatprep.subr.bf16.mxu0 %v2223_v45 }
 0x130   : > { %2226 = vmatpush3.bf16.msra.mxu0 %v2223_v45  ;;  %v1624_v45 = vld [vmem:[%s2954_s12 + $0x8] sm:$0xff] (!%p2041_p1) }
 0x132   : > { %2149 = vmatmul.mubr.msk.f32.vlgmr.msra.gmra.mrb[2].mxu1 %vm1071_vm2, %v1173_v37 }
 0x133   : > { %2159 = vmatpush3.msra.mxu1 %v1381_v4 }
 0x205   : > { %v2150_v48 = vpop.f32.mrb[2].mxu1 }
 0x206   : > { %v1262_v49 = vpop.f32.mrb[3].mxu1  ;;  %v1268_v51 = vadd.f32 %v2150_v48, %v1182_v46  ;;  %v1625_v46 = vld [vmem:[%s2954_s12 + $0x10] sm:$0xff] (!%p2041_p1)  ;;  %v1626_v48 = vld [vmem:[%s2954_s12 + $0x18] sm:$0xff] (!%p2041_p1) }
 0x207   : > { %v1263_v52 = vadd.f32 %v1262_v49, %v1181_v47  ;;  %v2235_v47 = vpack.c.bf16 (!%p2041_p1), %v1624_v45, %v1623_v44  ;;  %v2239_v49 = vpack.c.bf16 (!%p2041_p1), %v1626_v48, %v1625_v46  ;;  %v2052_v44 = vld [vmem:[%s2960_s18] ss:$0 sm:$0xff] (!%p2041_p1) }
 0x208   : > { %v1274_v56 = vadd.f32 %v1272_v53, %v1268_v51  ;;  %v1628_v51 = vld [vmem:[%s2954_s12 + $0x28] sm:$0xff] (!%p2041_p1) }
 0x209   : > { %v1273_v54 = vadd.f32 %v1271_v50, %v1263_v52  ;;  %v1627_v50 = vld [vmem:[%s2954_s12 + $0x20] sm:$0xff] (!%p2041_p1)  ;;  %2236 = vmatprep.subr.bf16.mxu1 (!%p2041_p1), %v2235_v47 }
 0x20a   : > { %v1279_v57 = vsel %vm1275_vm4, %v1274_v56, -inf  ;;  %v2243_v52 = vpack.c.bf16 (!%p2041_p1), %v1628_v51, %v1627_v50 }
 0x20b   : > { %v1276_v55 = vsel %vm1275_vm4, %v1273_v54, -inf }
 0x20c   : > { %1277 = vmax.xlane.f32.xlu0 %v1276_v55 }
 0x210   : > { %1280 = vmax.xlane.f32.xlu0 %v1279_v57 }
 0x299   : > { %v1278_v58 = vpop.xlane.xlu0 %1277 }
 0x29a   : > { %v1282_v59 = vsub.f32 %v1273_v54, %v1278_v58 }
 0x29c   : > { %v1284_v60 = vmul.f32 1.442695, %v1282_v59 }
 0x29d   : > { %v1281_v61 = vpop.xlane.xlu0 %1280 }
 0x29e   : > { %2325 = vpow2.f32 %v1284_v60  ;;  %v1283_v62 = vsub.f32 %v1274_v56, %v1281_v61  ;;  %v2043_v60 = vld [vmem:[%s2955_s24] ss:$0 sm:$0xff] (!%p2041_p1) }
 0x2a0   : > { %v1286_v63 = vmul.f32 1.442695, %v1283_v62  ;;  %v2044_v62 = vld [vmem:[%s2956_s30] ss:$0 sm:$0xff] (!%p2041_p1) }
 0x2a2   : > { %2327 = vpow2.f32 %v1286_v63 }
 0x2a8   : > { %v2326_v0 = vpop.eup %2325 }
 0x2a9   : > { %v1288_v1 = vsel %vm1275_vm4, %v2326_v0, 0.0 }
 0x2aa   : > { %1289 = vadd.xlane.f32.xlu1 %v1288_v1 }
 0x2ac   : > { %v2328_v2 = vpop.eup %2327 }
 0x2ad   : > { %v1291_v3 = vsel %vm1275_vm4, %v2328_v2, 0.0 }
 0x2ae   : > { %1292 = vadd.xlane.f32.xlu1 %v1291_v3 }
 0x337   : > { %v1290_v5 = vpop.xlane.xlu1 %1289 }
 0x338   : > { %2329 = vrcp.f32 %v1290_v5  ;;  %v1629_v5 = vld [vmem:[%s2954_s12 + $0x30] sm:$0xff] (!%p2041_p1) }
 0x33b   : > { %v1293_v6 = vpop.xlane.xlu1 %1292 }
 0x33c   : > { %2331 = vrcp.f32 %v1293_v6  ;;  %v1630_v6 = vld [vmem:[%s2954_s12 + $0x38] sm:$0xff] (!%p2041_p1) }
 0x342   : > { %v2330_v7 = vpop.eup %2329 }
 0x343   : > { %v1296_v8 = vmul.f32 %v2330_v7, %v2326_v0  ;;  %v2247_v7 = vpack.c.bf16 (!%p2041_p1), %v1630_v6, %v1629_v5 }
 0x345   : > { %2155 = vmatprep.mubr.msk.f32.mxu0 %vm1275_vm4, %v1296_v8  ;;  %v2045_v8 = vld [vmem:[%s2957_s14] ss:$0 sm:$0xff] (!%p2041_p1) }
 0x346   : > { %v2332_v9 = vpop.eup %2331 }
 0x347   : > { %v1297_v10 = vmul.f32 %v2332_v9, %v2328_v2 }
 0x349   : > { %2156 = vmatmul.mubr.msk.f32.vlgmr.msra.gmra.mrb[4].mxu0 %vm1275_vm4, %v1297_v10 }
 0x41c   : > { %v2157_v11 = vpop.f32.mrb[4].mxu0 }
 0x41d   : > { %v1370_v12 = vpop.f32.mrb[5].mxu0 }
 0x41e   : > { %2160 = vmatprep.mubr.msk.f32.mxu1 %vm1071_vm2, %v1370_v12 }
 0x41f   : > { %2161 = vmatmul.mubr.msk.f32.vlgmr.msra.gmra.mrb[4].mxu1 %vm1071_vm2, %v2157_v11 }
 0x420   : > { %2238 = vmatpush3.bf16.msra.mxu1 (!%p2041_p1), %v2235_v47 }
 0x421   : > { %2240 = vmatprep.subr.bf16.mxu1 (!%p2041_p1), %v2239_v49 }
 0x424   : > { %2242 = vmatpush3.bf16.msra.mxu1 (!%p2041_p1), %v2239_v49 }
 0x425   : > { %2244 = vmatprep.subr.bf16.mxu1 (!%p2041_p1), %v2243_v52 }
 0x428   : > { %2246 = vmatpush3.bf16.msra.mxu1 (!%p2041_p1), %v2243_v52 }
 0x429   : > { %2248 = vmatprep.subr.bf16.mxu1 (!%p2041_p1), %v2247_v7 }
 0x42c   : > { %2250 = vmatpush3.bf16.msra.mxu1 (!%p2041_p1), %v2247_v7 }
 0x4f0   : > { %1470 = sbr.rel (%p2041_p1) target bundleno = 2348 (0x92c), region = 112 }
 0x4f2   : > { %v2162_v17 = vpop.f32.mrb[4].mxu1 }
 0x4f3   : > { %v1464_v18 = vadd.f32 %v2162_v17, %v1380_v13  ;;  %v1454_v19 = vpop.f32.mrb[5].mxu1  ;;  %v2048_v17 = vld [vmem:[%s2958_s4] ss:$0 sm:$0xff] (!%p2041_p1) }
 0x4f4   : > { %v1463_v20 = vadd.f32 %v1454_v19, %v1379_v14 }
 0x4f5   : > { %1466 = vst.msk [vmem:[#allocation2 + $0x8] sm:$0xff] %vm901_vm1, %v1464_v18 }
 0x4f6   : > { %1465 = vst.msk [vmem:[#allocation2] sm:$0xff] %vm901_vm1, %v1463_v20 }
 0x4fc   : > { %v1472_v23 = vld [vmem:[#allocation2 + $0x8] sm:$0xff] }
 0x4fd   : > { %v1471_v21 = vld [vmem:[#allocation2] sm:$0xff]  ;;  %v1481_v25 = vadd.f32 %v2042_v22, %v1472_v23 }
 0x4fe   : > { %v1480_v24 = vadd.f32 %v2042_v22, %v1471_v21 }
 0x4ff   : > { %v1483_v27 = vadd.f32 %v1481_v25, %v2695_v16  ;;  %v1529_v16 = vld [vmem:[%s2953_s13] sm:$0xff] }
 0x500   : > { %v1482_v26 = vadd.f32 %v1480_v24, %v2689_v15  ;;  %v2227_v41 = vpack.c.bf16 %v1530_v39, %v1529_v16 }
 0x501   : > { %v1489_v29 = vsel %vm901_vm1, %v1483_v27, 0.0 }
 0x502   : > { %v1486_v28 = vsel %vm901_vm1, %v1482_v26, 0.0  ;;  %2228 = vmatprep.subr.bf16.mxu0 %v2227_v41 }
 0x503   : > { %1487 = vadd.xlane.f32.xlu0 %v1486_v28  ;;  %2230 = vmatpush3.bf16.msra.mxu0 %v2227_v41  ;;  %v2051_v41 = vld [vmem:[%s2959_s22] ss:$0 sm:$0xff] }
 0x504   : > { %2232 = vmatprep.subr.bf16.mxu0 %v2231_v43 }
 0x507   : > { %1490 = vadd.xlane.f32.xlu0 %v1489_v29  ;;  %2234 = vmatpush3.bf16.msra.mxu0 %v2231_v43 }
 0x590   : > { %v1488_v30 = vpop.xlane.xlu0 %1487 }
 0x591   : > { %v1493_v31 = vmul.f32 0.03125, %v1488_v30 }
 0x593   : > { %v1495_v32 = vsub.f32 %v1482_v26, %v1493_v31 }
 0x594   : > { %v1491_v33 = vpop.xlane.xlu0 %1490 }
 0x595   : > { %v1494_v34 = vmul.f32 0.03125, %v1491_v33  ;;  %v1497_v35 = vmul.f32 %v1495_v32, %v1495_v32 }
 0x597   : > { %v1496_v36 = vsub.f32 %v1483_v27, %v1494_v34  ;;  %v1499_v37 = vsel %vm901_vm1, %v1497_v35, 0.0 }
 0x598   : > { %1500 = vadd.xlane.f32.xlu1 %v1499_v37 }
 0x599   : > { %v1498_v38 = vmul.f32 %v1496_v36, %v1496_v36 }
 0x59b   : > { %v1502_v15 = vsel %vm901_vm1, %v1498_v38, 0.0 }
 0x59c   : > { %1503 = vadd.xlane.f32.xlu1 %v1502_v15 }
 0x625   : > { %v1501_v53 = vpop.xlane.xlu1 %1500 }
 0x626   : > { %v1505_v54 = vmul.f32 0.03125, %v1501_v53 }
 0x628   : > { %v1507_v55 = vadd.f32 1e-05, %v1505_v54 }
 0x629   : > { %v1504_v56 = vpop.xlane.xlu1 %1503 }
 0x62a   : > { %2333 = vrsqrt.f32 %v1507_v55  ;;  %v1506_v57 = vmul.f32 0.03125, %v1504_v56 }
 0x62c   : > { %v1508_v58 = vadd.f32 1e-05, %v1506_v57 }
 0x62e   : > { %2335 = vrsqrt.f32 %v1508_v58 }
 0x634   : > { %v2334_v59 = vpop.eup %2333 }
 0x635   : > { %v1511_v61 = vmul.f32 %v2334_v59, %v1495_v32 }
 0x637   : > { %v1519_v63 = vmul.f32 %v2043_v60, %v1511_v61 }
 0x638   : > { %v2336_v0 = vpop.eup %2335 }
 0x639   : > { %v1512_v1 = vmul.f32 %v2336_v0, %v1496_v36  ;;  %v1527_v2 = vadd.f32 %v2044_v62, %v1519_v63 }
 0x63b   : > { %v1520_v3 = vmul.f32 %v2043_v60, %v1512_v1  ;;  %2171 = vmatprep.mubr.msk.f32.mxu0 %vm901_vm1, %v1527_v2 }
 0x63d   : > { %v1528_v4 = vadd.f32 %v2044_v62, %v1520_v3 }
 0x63f   : > { %2172 = vmatmul.mubr.msk.f32.vlgmr.msra.gmra.mrb[0].mxu0 %vm901_vm1, %v1528_v4 }
 0x712   : > { %v2173_v9 = vpop.f32.mrb[0].mxu0 }
 0x713   : > { %v1618_v10 = vadd.f32 %v2173_v9, %v2045_v8  ;;  %v1612_v11 = vpop.f32.mrb[1].mxu0 }
 0x714   : > { %v1613_v12 = vadd.f32 %v2045_v8, %v1612_v11 }
 0x715   : > { %v1622_v14 = vmax.f32 %v1618_v10, 0.0 }
 0x716   : > { %v1621_v13 = vmax.f32 %v1613_v12, 0.0 }
 0x718   : > { %2190 = vmatprep.mubr.msk.f32.mxu1 %vm1638_vm5, %v1621_v13 }
 0x719   : > { %2191 = vmatmul.mubr.msk.f32.vlgmr.msra.gmra.mrb[0].mxu1 %vm1638_vm5, %v1622_v14 }
 0x7ec   : > { %v2192_v18 = vpop.f32.mrb[0].mxu1 }
 0x7ed   : > { %v1717_v19 = vadd.f32 %v2192_v18, %v2048_v17  ;;  %v1711_v20 = vpop.f32.mrb[1].mxu1 }
 0x7ee   : > { %v1712_v21 = vadd.f32 %v2048_v17, %v1711_v20 }
 0x7ef   : > { %v1721_v22 = vadd.f32 %v1717_v19, %v1528_v4 }
 0x7f0   : > { %v1720_v23 = vadd.f32 %v1712_v21, %v1527_v2 }
 0x7f1   : > { %v1727_v24 = vsel %vm901_vm1, %v1721_v22, 0.0 }
 0x7f2   : > { %1728 = vadd.xlane.f32.xlu1 %v1727_v24  ;;  %v1724_v25 = vsel %vm901_vm1, %v1720_v23, 0.0 }
 0x7f3   : > { %1725 = vadd.xlane.f32.xlu0 %v1724_v25 }
 0x87f   : > { %v1729_v26 = vpop.xlane.xlu1 %1728 }
 0x880   : > { %v1731_v27 = vmul.f32 0.03125, %v1729_v26  ;;  %v1726_v28 = vpop.xlane.xlu0 %1725 }
 0x881   : > { %v1730_v29 = vmul.f32 0.03125, %v1726_v28 }
 0x882   : > { %v1733_v30 = vsub.f32 %v1721_v22, %v1731_v27 }
 0x883   : > { %v1732_v31 = vsub.f32 %v1720_v23, %v1730_v29 }
 0x884   : > { %v1735_v32 = vmul.f32 %v1733_v30, %v1733_v30 }
 0x885   : > { %v1734_v33 = vmul.f32 %v1732_v31, %v1732_v31 }
 0x886   : > { %v1739_v34 = vsel %vm901_vm1, %v1735_v32, 0.0 }
 0x887   : > { %1740 = vadd.xlane.f32.xlu1 %v1739_v34  ;;  %v1736_v35 = vsel %vm901_vm1, %v1734_v33, 0.0 }
 0x888   : > { %1737 = vadd.xlane.f32.xlu0 %v1736_v35 }
 0x914   : > { %v1741_v36 = vpop.xlane.xlu1 %1740 }
 0x915   : > { %v1743_v37 = vmul.f32 0.03125, %v1741_v36  ;;  %v1738_v38 = vpop.xlane.xlu0 %1737 }
 0x916   : > { %v1742_v15 = vmul.f32 0.03125, %v1738_v38 }
 0x917   : > { %v1745_v16 = vadd.f32 1e-05, %v1743_v37 }
 0x918   : > { %v1744_v39 = vadd.f32 1e-05, %v1742_v15 }
 0x919   : > { %2337 = vrsqrt.f32 %v1745_v16 }
 0x91a   : > { %2339 = vrsqrt.f32 %v1744_v39 }
 0x923   : > { %v2338_v40 = vpop.eup %2337 }
 0x924   : > { %v2340_v42 = vpop.eup %2339  ;;  %v1749_v43 = vmul.f32 %v2338_v40, %v1733_v30 }
 0x925   : > { %v1748_v45 = vmul.f32 %v2340_v42, %v1732_v31 }
 0x926   : > { %v1757_v46 = vmul.f32 %v2051_v41, %v1749_v43 }
 0x927   : > { %v1756_v47 = vmul.f32 %v2051_v41, %v1748_v45 }
 0x928   : > { %v1765_v48 = vadd.f32 %v2052_v44, %v1757_v46 }
 0x929   : > { %v1764_v49 = vadd.f32 %v2052_v44, %v1756_v47 }
 0x92a   : > { %1767 = vst.msk [vmem:[%s2677_s11 + $0x8] sm:$0xff] %vm901_vm1, %v1765_v48 }
 0x92b   : > { %1766 = vst.msk [vmem:[%s2677_s11] sm:$0xff] %vm901_vm1, %v1764_v49 }
 0x92c PF: > { %s2961_s0 = sld [smem:[#allocation11_spill]]  ;;  %s2964_s21 = sld [smem:[#allocation34_spill]] }
 0x92d   : > { %s2962_s1 = sld [smem:[#allocation9_spill]]  ;;  %s1784_s3 = sshll.u32 %s2677_s11, 4  ;;  %s2824_s3 = int_to_ptr.vmem [resolvable:$true] %s1784_s3 }
 0x92e   : > { %s2341_s20 = scalar_lea.vmem %s2824_s3, 256  ;;  %s2438_s14 = smov [#allocation5]  }
 0x92f   : > { %p2342_p2 = scmp.ne.s32.totalorder %s2824_s3, %s2341_s20  ;;  %s2345_s16 = sshll.u32 %s2438_s14, 4  ;;  %s2346_s16 = int_to_ptr.vmem [resolvable:$false] %s2345_s16 }
 0x930   : > { %s2347_s25 = scalar_lea.vmem %s2346_s16, 512  ;;  %p2348_p6 = scmp.lt.s32.totalorder %s2824_s3, %s2346_s16 }
 0x931   : > { %p2343_p4 = pnand %p2342_p2, %p2595_p3  ;;  %p2349_p7 = scmp.lt.s32.totalorder %s2347_s25, %s2341_s20 }
 0x932   : > { %s2065_s26 = sshll.u32 %s2961_s0, 8 }
 0x933   : > { %s2821_s29 = scalar_lea.hbm %s2964_s21, %s2065_s26  ;;  %s2965_s27 = sand.u32 1, %s2962_s1  }
 0x934   : > { %s2828_s23 = scalar_lea.sflag [#allocation6], %s2965_s27  ;;  %p2344_p5 = pneg %p2343_p4 }
 0x935   : > { %p2350_p8 = por %p2349_p7, %p2348_p6 }
 0x937   : > { %p2351_p10 = pnand %p2350_p8, %p2344_p5 }
 0x939   : > { %2354 = shalt.err (!%p2351_p10)
}
 0x93a   : > { %s2355_s11 = scalar_lea.hbm %s2821_s29, 256  ;;  %s2359_s19 = scalar_lea.hbm %s2964_s21, 512 }
 0x93b   : > { %p2356_p11 = scmp.ne.s32.totalorder %s2821_s29, %s2355_s11  ;;  %p2360_p0 = scmp.lt.u32.totalorder %s2821_s29, %s2964_s21 }
 0x93c   : > { %p2361_p1 = scmp.lt.u32.totalorder %s2359_s19, %s2355_s11  ;;  %p2363_p4 = scmp.lt.u32.totalorder %s2355_s11, %s2821_s29 }
 0x93d   : > { %p2357_p12 = pnand %p2356_p11, %p2595_p3 }
 0x93e   : > { %p2362_p2 = por %p2361_p1, %p2360_p0 }
 0x93f   : > { %p2358_p13 = pneg %p2357_p12 }
 0x940   : > { %p2364_p5 = por %p2363_p4, %p2362_p2 }
 0x942   : > { %p2365_p6 = pnand %p2364_p5, %p2358_p13 }
 0x944   : > { %2368 = shalt.err (!%p2365_p6)
}
 0x945   : > { %s2439_s15 = smov 128   ;;  %s2440_s18 = smov 8  }
 0x946   : > { %2251 = dma.vmem_to_hbm [thread:$0]  (%p2595_p3), %s2824_s3, 256, %s2821_s29, %s2828_s23, %s2439_s15, %s2439_s15, %s2440_s18  }
 0x947 PF: > { %s2966_s0 = sld [smem:[#allocation14_spill]]  ;;  %s2967_s1 = sld [smem:[#allocation8_spill]] }
 0x94d   : > { %p2257_p7 = scmp.ge.s32.totalorder %s2966_s0, 2  ;;  %s1799_s17 = sand.u32 1, %s2967_s1  }
 0x94e   : > { %s1800_s30 = scalar_lea.sflag [#allocation6], %s1799_s17 }
 0x94f   : > { %p2254_p8 = pnand %p2257_p7, %p2605_p9 }
 0x951   : > { %2402 = dma.done.wait (!%p2254_p8), %s1800_s30, 256  }
 0x952   : > { %2404 = vsyncadd (!%p2254_p8), %s1800_s30, 4294967040  ;;  %s33_s26 = sadd.s32 1, %s2966_s0   ;;  %s2969_s1 = sld [smem:[#allocation9_spill]] }
 0x953   : > { %p30_p10 = scmp.ge.s32.totalorder %s33_s26, 10   ;;  %s2970_s22 = sld [smem:[#allocation10_spill]] }
 0x954   : > { %s2971_s23 = sld [smem:[#allocation19_spill]]  ;;  %s2972_s24 = sld [smem:[#allocation12_spill]] }
 0x955   : > { %s2973_s2 = sld [smem:[#allocation13_spill]]  ;;  %s2974_s25 = sld [smem:[#allocation15_spill]] }
 0x956   : > { %s2975_s3 = sld [smem:[#allocation17_spill]]  ;;  %32 = sbr.rel (!%p30_p10) target bundleno = 21 (0x15), region = 181 }
 0x95d   :  { %1805 = vsyncpa [#allocation6], 1 }
 0x95e   :  { %1807 = vsyncpa [#allocation6 + $0x1], 1 }

</bundles_post_ra>
